<compile_context>
chip_gen: v6e
topology: v6e:2x2x1
jax: 0.10.0
libtpu: 0.0.40
codegen_flags: <defaults>
</compile_context>

<pallas_src>
import jax
import jax.numpy as jnp
from jax.experimental import pallas as pl
from jax.experimental.pallas import tpu as pltpu


def _round_up(x, m):
    return ((x + m - 1) // m) * m


def pointnet_kernel(x_ref, w1_ref, b1_ref, w2_ref, b2_ref, o_ref):
    # x_ref:  (TB, D, TN)   channels-first block: points on the lane axis
    # w1_ref: (D, H, 1)     conv1 weight columns (f32)
    # b1_ref: (H, 1)        conv1 bias column (f32)
    # w2_ref: (TB, F, H)    conv2 weight, transposed + pre-broadcast (bf16)
    # b2_ref: (1, F)        conv2 bias (f32)
    # o_ref:  (TB, F)       running max over points, resident across the ni axis
    ni = pl.program_id(1)

    @pl.when(ni == 0)
    def _init():
        o_ref[...] = jnp.full(o_ref.shape, -jnp.inf, dtype=o_ref.dtype)

    d_in = x_ref.shape[1]

    x = x_ref[...]                                    # (TB, D, TN) f32

    # conv1 (1x1, D->H) as D broadcast FMAs on the VPU in f32 -- K=D=3 is far
    # too small for the MXU.  x rows broadcast over H sublanes, w1 columns
    # broadcast over TN lanes; everything is lane-dense.
    h = x[:, 0:1, :] * w1_ref[0] + b1_ref[...]        # (TB, H, TN)
    for d in range(1, d_in):                          # static unroll, D is tiny
        h = h + x[:, d:d + 1, :] * w1_ref[d]
    h = jnp.maximum(h, 0.0)                           # ReLU (f32, VPU)

    # conv2 (1x1, H->F) on the MXU: bf16 inputs, f32 accumulation.
    y = jnp.einsum("bfc,bcn->bfn", w2_ref[...], h.astype(jnp.bfloat16),
                   preferred_element_type=jnp.float32)        # (TB, F, TN) f32

    # Running max over the point (lane) axis, accumulated in the output block.
    o_ref[...] = jnp.maximum(o_ref[...], jnp.max(y, axis=-1))  # (TB, F)

    @pl.when(ni == pl.num_programs(1) - 1)
    def _finalize():
        o_ref[...] = o_ref[...] + b2_ref[...]         # bias hoisted past the max


def pointnet_encoder(x, w1, b1, w2, b2, *, tb=None, tn=None):
    """x: (B, N, D) f32. w1:(D,H) b1:(1,H) w2:(H,F) b2:(1,F). Returns (B, F) f32."""
    B, N, D = x.shape
    H = w1.shape[1]
    F = w2.shape[1]
    assert w1.shape == (D, H) and b1.shape == (1, H)
    assert w2.shape == (H, F) and b2.shape == (1, F)

    LANE, SUB = 128, 8

    # Tile sizes: points (lanes) are the main tiling axis; keep the batch axis
    # split into >=2 grid steps when B allows so both v7x TensorCores get work.
    if tb is None:
        b8 = _round_up(B, SUB)
        tb = 16 if (b8 % 16 == 0) else SUB
        if B > SUB and b8 // tb < 2:
            tb = SUB
    tb = _round_up(tb, SUB)
    if tn is None:
        tn = min(_round_up(N, LANE), 1024)
    tn = _round_up(tn, LANE)

    B_pad = _round_up(B, tb)
    N_pad = _round_up(N, tn)

    # Channels-first layout (the PyTorch forward's transpose): points on lanes.
    xt = jnp.swapaxes(x, 1, 2)                        # (B, D, N)
    # Edge-replicate padding keeps the max unchanged; padded batch rows are
    # sliced off afterwards.
    if (B_pad, N_pad) != (B, N):
        xt = jnp.pad(xt, ((0, B_pad - B), (0, 0), (0, N_pad - N)), mode="edge")

    # Weights in kernel-friendly layouts (done once in the wrapper, not per step).
    w1k = w1.astype(jnp.float32).reshape(D, H, 1)     # conv1 weight columns
    b1k = b1.astype(jnp.float32).reshape(H, 1)        # conv1 bias column
    w2k = jnp.broadcast_to(                           # conv2 weight, (TB, F, H) bf16
        jnp.swapaxes(w2, 0, 1).astype(jnp.bfloat16)[None], (tb, F, H))
    b2k = b2.astype(jnp.float32)                      # (1, F)

    grid = (B_pad // tb, N_pad // tn)                 # reduction (points) axis last

    flops = 2 * B_pad * N_pad * (D * H + H * F)
    bytes_accessed = (4 * B_pad * D * N_pad + 4 * B_pad * F
                      + 4 * (D * H + H + F) + 2 * tb * F * H)

    out = pl.pallas_call(
        pointnet_kernel,
        out_shape=jax.ShapeDtypeStruct((B_pad, F), jnp.float32),
        grid_spec=pltpu.PrefetchScalarGridSpec(
            num_scalar_prefetch=0,
            grid=grid,
            in_specs=[
                pl.BlockSpec((tb, D, tn), lambda bi, ni: (bi, 0, ni)),   # points
                pl.BlockSpec((D, H, 1), lambda bi, ni: (0, 0, 0)),       # conv1 W
                pl.BlockSpec((H, 1), lambda bi, ni: (0, 0)),             # conv1 b
                pl.BlockSpec((tb, F, H), lambda bi, ni: (0, 0, 0)),      # conv2 W
                pl.BlockSpec((1, F), lambda bi, ni: (0, 0)),             # conv2 b
            ],
            out_specs=pl.BlockSpec((tb, F), lambda bi, ni: (bi, 0)),
        ),
        compiler_params=pltpu.CompilerParams(
            dimension_semantics=("parallel", "arbitrary")),
        cost_estimate=pl.CostEstimate(flops=int(flops), transcendentals=0,
                                      bytes_accessed=int(bytes_accessed)),
    )(xt, w1k, b1k, w2k, b2k)

    return out[:B]


def reference(x, w1, b1, w2, b2):
    hp = jax.lax.Precision.HIGHEST
    h = jnp.maximum(jnp.einsum("bnd,dh->bnh", x, w1, precision=hp) + b1[0], 0.0)
    y = jnp.einsum("bnh,hf->bnf", h, w2, precision=hp) + b2[0]
    return jnp.max(y, axis=1)


if __name__ == "__main__":
    D, HID, FEAT = 3, 32, 64          # input_dim, conv1 out channels, feat_size

    key = jax.random.PRNGKey(0)
    kx, k1, kb1, k2, kb2, kx2, kx3 = jax.random.split(key, 7)

    # PyTorch Conv1d weight is (out, in, 1); here we store the equivalent
    # (in, out) matrix used by the per-point linear layers.
    w1 = jax.random.normal(k1, (D, HID), dtype=jnp.float32) * 0.1
    b1 = jax.random.normal(kb1, (1, HID), dtype=jnp.float32) * 0.1
    w2 = jax.random.normal(k2, (HID, FEAT), dtype=jnp.float32) * 0.1
    b2 = jax.random.normal(kb2, (1, FEAT), dtype=jnp.float32) * 0.1

    # Tolerance reflects the bf16 MXU path for conv2 (f32 accumulation).
    ATOL = RTOL = 2e-2

    # Case 1: small shapes (batch=2, 16 points, input_dim=3).
    B, N = 2, 16
    x = jax.random.normal(kx, (B, N, D), dtype=jnp.float32)
    out = jax.block_until_ready(pointnet_encoder(x, w1, b1, w2, b2))
    ref = reference(x, w1, b1, w2, b2)
    assert out.shape == (B, FEAT)
    assert jnp.allclose(out, ref, atol=ATOL, rtol=RTOL), "mismatch vs reference (case 1)"

    # Case 2: odd shapes exercising batch padding, N padding and N tiling.
    B2, N2 = 5, 200
    x2 = jax.random.normal(kx2, (B2, N2, D), dtype=jnp.float32)
    out2 = jax.block_until_ready(pointnet_encoder(x2, w1, b1, w2, b2, tn=128))
    ref2 = reference(x2, w1, b1, w2, b2)
    assert out2.shape == (B2, FEAT)
    assert jnp.allclose(out2, ref2, atol=ATOL, rtol=RTOL), "mismatch vs reference (case 2)"

    # Case 3: multiple batch tiles (parallel grid axis) + multiple point tiles.
    B3, N3 = 20, 300
    x3 = jax.random.normal(kx3, (B3, N3, D), dtype=jnp.float32)
    out3 = jax.block_until_ready(pointnet_encoder(x3, w1, b1, w2, b2))
    ref3 = reference(x3, w1, b1, w2, b2)
    assert out3.shape == (B3, FEAT)
    assert jnp.allclose(out3, ref3, atol=ATOL, rtol=RTOL), "mismatch vs reference (case 3)"

    print("KERNEL_OK")
</pallas_src>

<mosaic_0001>
module attributes {stable_mosaic.version = 11 : i64} {
  func.func @pointnet_kernel(%arg0: i32, %arg1: i32, %arg2: memref<8x3x128xf32, #tpu.memory_space<vmem>>, %arg3: memref<3x32x1xf32, #tpu.memory_space<vmem>>, %arg4: memref<32x1xf32, #tpu.memory_space<vmem>>, %arg5: memref<8x64x32xbf16, #tpu.memory_space<vmem>>, %arg6: memref<1x64xf32, #tpu.memory_space<vmem>>, %arg7: memref<8x64xf32, #tpu.memory_space<vmem>>) attributes {dimension_semantics = [#tpu.dimension_semantics<parallel>, #tpu.dimension_semantics<arbitrary>], iteration_bounds = array<i64: 1, 1>, scalar_prefetch = 0 : i64, scratch_operands = 0 : i64, tpu.core_type = #tpu.core_type<tc>, window_params = [{transform_indices = @transform_0, window_bounds = array<i64: 8, 3, 128>}, {pipeline_mode = #tpu.pipeline_mode<synchronous>, transform_indices = @transform_1, window_bounds = array<i64: 3, 32, 1>}, {pipeline_mode = #tpu.pipeline_mode<synchronous>, transform_indices = @transform_2, window_bounds = array<i64: 32, 1>}, {pipeline_mode = #tpu.pipeline_mode<synchronous>, transform_indices = @transform_3, window_bounds = array<i64: 8, 64, 32>}, {pipeline_mode = #tpu.pipeline_mode<synchronous>, transform_indices = @transform_4, window_bounds = array<i64: 1, 64>}, {transform_indices = @transform_5, window_bounds = array<i64: 8, 64>}]} {
    %c0_i32 = arith.constant 0 : i32
    %0 = arith.cmpi eq, %arg1, %c0_i32 : i32
    %1 = arith.extui %0 : i1 to i32
    %c0_i32_0 = arith.constant 0 : i32
    %2 = arith.cmpi ne, %1, %c0_i32_0 : i32
    scf.if %2 {
      %cst_23 = arith.constant 0xFF800000 : f32
      %43 = vector.broadcast %cst_23 : f32 to vector<8x64xf32>
      %c0_24 = arith.constant 0 : index
      %c0_25 = arith.constant 0 : index
      %44 = vector.load %arg7[%c0_24, %c0_25] : memref<8x64xf32, #tpu.memory_space<vmem>>, vector<8x64xf32>
      tpu.vector_store %arg7[%c0_24, %c0_25], %43 {strides = array<i32>} : memref<8x64xf32, #tpu.memory_space<vmem>>, vector<8x64xf32>,
    } else {
    }
    %c0 = arith.constant 0 : index
    %c0_1 = arith.constant 0 : index
    %c0_2 = arith.constant 0 : index
    %3 = vector.load %arg2[%c0, %c0_1, %c0_2] : memref<8x3x128xf32, #tpu.memory_space<vmem>>, vector<8x3x128xf32>
    %4 = vector.extract_strided_slice %3 {offsets = [0, 0, 0], sizes = [8, 1, 128], strides = [1, 1, 1]} : vector<8x3x128xf32> to vector<8x1x128xf32>
    %c0_3 = arith.constant 0 : index
    %c0_4 = arith.constant 0 : index
    %c0_5 = arith.constant 0 : index
    %5 = vector.load %arg3[%c0_3, %c0_4, %c0_5] : memref<3x32x1xf32, #tpu.memory_space<vmem>>, vector<1x32x1xf32>
    %6 = vector.shape_cast %5 : vector<1x32x1xf32> to vector<32x1xf32>
    %7 = vector.shape_cast %6 : vector<32x1xf32> to vector<1x32x1xf32>
    %8 = vector.broadcast %4 : vector<8x1x128xf32> to vector<8x32x128xf32>
    %9 = vector.broadcast %7 : vector<1x32x1xf32> to vector<8x32x128xf32>
    %10 = arith.mulf %8, %9 : vector<8x32x128xf32>
    %c0_6 = arith.constant 0 : index
    %c0_7 = arith.constant 0 : index
    %11 = vector.load %arg4[%c0_6, %c0_7] : memref<32x1xf32, #tpu.memory_space<vmem>>, vector<32x1xf32>
    %12 = vector.shape_cast %11 : vector<32x1xf32> to vector<1x32x1xf32>
    %13 = vector.broadcast %12 : vector<1x32x1xf32> to vector<8x32x128xf32>
    %14 = arith.addf %10, %13 : vector<8x32x128xf32>
    %15 = vector.extract_strided_slice %3 {offsets = [0, 1, 0], sizes = [8, 1, 128], strides = [1, 1, 1]} : vector<8x3x128xf32> to vector<8x1x128xf32>
    %c1 = arith.constant 1 : index
    %c0_8 = arith.constant 0 : index
    %c0_9 = arith.constant 0 : index
    %16 = vector.load %arg3[%c1, %c0_8, %c0_9] : memref<3x32x1xf32, #tpu.memory_space<vmem>>, vector<1x32x1xf32>
    %17 = vector.shape_cast %16 : vector<1x32x1xf32> to vector<32x1xf32>
    %18 = vector.shape_cast %17 : vector<32x1xf32> to vector<1x32x1xf32>
    %19 = vector.broadcast %15 : vector<8x1x128xf32> to vector<8x32x128xf32>
    %20 = vector.broadcast %18 : vector<1x32x1xf32> to vector<8x32x128xf32>
    %21 = arith.mulf %19, %20 : vector<8x32x128xf32>
    %22 = arith.addf %14, %21 : vector<8x32x128xf32>
    %23 = vector.extract_strided_slice %3 {offsets = [0, 2, 0], sizes = [8, 1, 128], strides = [1, 1, 1]} : vector<8x3x128xf32> to vector<8x1x128xf32>
    %c2 = arith.constant 2 : index
    %c0_10 = arith.constant 0 : index
    %c0_11 = arith.constant 0 : index
    %24 = vector.load %arg3[%c2, %c0_10, %c0_11] : memref<3x32x1xf32, #tpu.memory_space<vmem>>, vector<1x32x1xf32>
    %25 = vector.shape_cast %24 : vector<1x32x1xf32> to vector<32x1xf32>
    %26 = vector.shape_cast %25 : vector<32x1xf32> to vector<1x32x1xf32>
    %27 = vector.broadcast %23 : vector<8x1x128xf32> to vector<8x32x128xf32>
    %28 = vector.broadcast %26 : vector<1x32x1xf32> to vector<8x32x128xf32>
    %29 = arith.mulf %27, %28 : vector<8x32x128xf32>
    %30 = arith.addf %22, %29 : vector<8x32x128xf32>
    %cst = arith.constant 0.000000e+00 : f32
    %31 = vector.broadcast %cst : f32 to vector<8x32x128xf32>
    %32 = arith.maximumf %30, %31 : vector<8x32x128xf32>
    %c0_12 = arith.constant 0 : index
    %c0_13 = arith.constant 0 : index
    %c0_14 = arith.constant 0 : index
    %33 = vector.load %arg5[%c0_12, %c0_13, %c0_14] : memref<8x64x32xbf16, #tpu.memory_space<vmem>>, vector<8x64x32xbf16>
    %34 = arith.truncf %32 : vector<8x32x128xf32> to vector<8x32x128xbf16>
    "tpu.trace_start"() <{level = 10 : i32, message = "bfc,bcn->bfn"}> : () -> ()
    %cst_15 = arith.constant dense<0.000000e+00> : vector<8x64x128xf32>
    %35 = tpu.matmul %33, %34, %cst_15 {dimension_numbers = #tpu.dot_dimension_numbers<[2], [1], [1], [2], [0, 0, 0, 1, 1, 2], [0], [0]>} : vector<8x64x32xbf16>, vector<8x32x128xbf16>, vector<8x64x128xf32> -> vector<8x64x128xf32>
    "tpu.trace_stop"() : () -> ()
    %c0_16 = arith.constant 0 : index
    %c0_17 = arith.constant 0 : index
    %36 = vector.load %arg7[%c0_16, %c0_17] : memref<8x64xf32, #tpu.memory_space<vmem>>, vector<8x64xf32>
    %cst_18 = arith.constant dense<0xFF800000> : vector<8x64xf32>
    %37 = vector.multi_reduction <maximumf>, %35, %cst_18 [2] : vector<8x64x128xf32> to vector<8x64xf32>
    %38 = arith.maximumf %36, %37 : vector<8x64xf32>
    %c0_19 = arith.constant 0 : index
    %c0_20 = arith.constant 0 : index
    %39 = vector.load %arg7[%c0_19, %c0_20] : memref<8x64xf32, #tpu.memory_space<vmem>>, vector<8x64xf32>
    tpu.vector_store %arg7[%c0_19, %c0_20], %38 {strides = array<i32>} : memref<8x64xf32, #tpu.memory_space<vmem>>, vector<8x64xf32>,
    %c0_i32_21 = arith.constant 0 : i32
    %40 = arith.cmpi eq, %arg1, %c0_i32_21 : i32
    %41 = arith.extui %40 : i1 to i32
    %c0_i32_22 = arith.constant 0 : i32
    %42 = arith.cmpi ne, %41, %c0_i32_22 : i32
    scf.if %42 {
      %c0_23 = arith.constant 0 : index
      %c0_24 = arith.constant 0 : index
      %43 = vector.load %arg7[%c0_23, %c0_24] : memref<8x64xf32, #tpu.memory_space<vmem>>, vector<8x64xf32>
      %c0_25 = arith.constant 0 : index
      %c0_26 = arith.constant 0 : index
      %44 = vector.load %arg6[%c0_25, %c0_26] : memref<1x64xf32, #tpu.memory_space<vmem>>, vector<1x64xf32>
      %45 = vector.broadcast %44 : vector<1x64xf32> to vector<8x64xf32>
      %46 = arith.addf %43, %45 : vector<8x64xf32>
      %c0_27 = arith.constant 0 : index
      %c0_28 = arith.constant 0 : index
      %47 = vector.load %arg7[%c0_27, %c0_28] : memref<8x64xf32, #tpu.memory_space<vmem>>, vector<8x64xf32>
      tpu.vector_store %arg7[%c0_27, %c0_28], %46 {strides = array<i32>} : memref<8x64xf32, #tpu.memory_space<vmem>>, vector<8x64xf32>,
    } else {
    }
    return
  }
  func.func @transform_0(%arg0: i32, %arg1: i32) -> (i32, i32, i32) {
    %c0_i32 = arith.constant 0 : i32
    %c0_i32_0 = arith.constant 0 : i32
    return %arg0, %c0_i32, %arg1 : i32, i32, i32
  }
  func.func @transform_1(%arg0: i32, %arg1: i32) -> (i32, i32, i32) {
    %c0_i32 = arith.constant 0 : i32
    %c0_i32_0 = arith.constant 0 : i32
    %c0_i32_1 = arith.constant 0 : i32
    %c0_i32_2 = arith.constant 0 : i32
    return %c0_i32, %c0_i32_0, %c0_i32_1 : i32, i32, i32
  }
  func.func @transform_2(%arg0: i32, %arg1: i32) -> (i32, i32) {
    %c0_i32 = arith.constant 0 : i32
    %c0_i32_0 = arith.constant 0 : i32
    %c0_i32_1 = arith.constant 0 : i32
    return %c0_i32, %c0_i32_0 : i32, i32
  }
  func.func @transform_3(%arg0: i32, %arg1: i32) -> (i32, i32, i32) {
    %c0_i32 = arith.constant 0 : i32
    %c0_i32_0 = arith.constant 0 : i32
    %c0_i32_1 = arith.constant 0 : i32
    %c0_i32_2 = arith.constant 0 : i32
    return %c0_i32, %c0_i32_0, %c0_i32_1 : i32, i32, i32
  }
  func.func @transform_4(%arg0: i32, %arg1: i32) -> (i32, i32) {
    %c0_i32 = arith.constant 0 : i32
    %c0_i32_0 = arith.constant 0 : i32
    %c0_i32_1 = arith.constant 0 : i32
    return %c0_i32, %c0_i32_0 : i32, i32
  }
  func.func @transform_5(%arg0: i32, %arg1: i32) -> (i32, i32) {
    %c0_i32 = arith.constant 0 : i32
    %c0_i32_0 = arith.constant 0 : i32
    return %arg0, %c0_i32 : i32, i32
  }
}

</mosaic_0001>

<bundles_post_ra>
// kernel: tpu_custom_call.1
= control target key start
LH: loop header
LB: loop body
LE: loop exit
PB: predicated region body
PF: predicated region fallthrough
CT: control target
= control target key end

     0   :  { %v2153_v2 = vmov 0   ;;  %s2901_s0 = inlined_call_operand.vmem [shape: f32[8,3,128], index: 0, kind: input, shape index: {}]   ;;  %s2902_s1 = inlined_call_operand.vmem [shape: f32[3,32,1], index: 1, kind: input, shape index: {}]   ;;  %s2903_s2 = inlined_call_operand.vmem [shape: f32[32,1], index: 2, kind: input, shape index: {}]   ;;  %s2904_s3 = inlined_call_operand.vmem [shape: bf16[8,64,32], index: 3, kind: input, shape index: {}]   ;;  %s2905_s4 = inlined_call_operand.vmem [shape: f32[1,64], index: 4, kind: input, shape index: {}]   ;;  %s2906_s5 = inlined_call_operand.hbm [shape: f32[8,64], index: 5, kind: output, shape index: {}]  }
   0x1   :  { %v126_v0 = vld [vmem:[%s2903_s2 + $0x10] sm:$0xff]  ;;  %2098 = vset.pattern.permute.xlu1 %v2153_v2  ;;  %2097 = vset.pattern.permute.xlu0 %v2153_v2  ;;  %v127_v3 = vld [vmem:[%s2903_s2 + $0x18] sm:$0xff]  ;;  %v37_v7 = vld [vmem:[%s2902_s1 + $0x8] sm:$0xff] }
   0x2   :  { %v38_v1 = vld [vmem:[%s2902_s1 + $0x10] sm:$0xff]  ;;  %140 = vperm.xlu1 %2098, %v126_v0   ;;  %v39_v4 = vld [vmem:[%s2902_s1 + $0x18] sm:$0xff]  ;;  %v36_v8 = vld [vmem:[%s2902_s1] sm:$0xff] }
   0x3   :  { %84 = vperm.xlu0 %2097, %v38_v1   ;;  %v1880_v5 = vld [vmem:[%s2902_s1 + $0x38] sm:$0xff]  ;;  %v1879_v6 = vld [vmem:[%s2902_s1 + $0x30] sm:$0xff]  ;;  %v125_v11 = vld [vmem:[%s2903_s2 + $0x8] sm:$0xff] }
   0x4   :  { %v1884_v9 = vld [vmem:[%s2902_s1 + $0x58] sm:$0xff]  ;;  %v1883_v10 = vld [vmem:[%s2902_s1 + $0x50] sm:$0xff]  ;;  %v124_v12 = vld [vmem:[%s2903_s2] sm:$0xff] }
   0x5   :  { %v1878_v13 = vld [vmem:[%s2902_s1 + $0x28] sm:$0xff]  ;;  %v1877_v14 = vld [vmem:[%s2902_s1 + $0x20] sm:$0xff] }
   0x6   :  { %145 = vperm.xlu1 %2098, %v127_v3   ;;  %v1882_v15 = vld [vmem:[%s2902_s1 + $0x48] sm:$0xff]  ;;  %v1881_v16 = vld [vmem:[%s2902_s1 + $0x40] sm:$0xff] }
   0x7   :  { %89 = vperm.xlu0 %2097, %v39_v4  }
   0xa   :  { %234 = vperm.xlu1 %2098, %v1880_v5  }
   0xb   :  { %229 = vperm.xlu0 %2097, %v1879_v6  }
   0xe   :  { %79 = vperm.xlu1 %2098, %v37_v7  }
   0xf   :  { %74 = vperm.xlu0 %2097, %v36_v8  }
  0x12   :  { %355 = vperm.xlu1 %2098, %v1884_v9  }
  0x13   :  { %350 = vperm.xlu0 %2097, %v1883_v10  }
  0x16   :  { %135 = vperm.xlu1 %2098, %v125_v11  }
  0x17   :  { %130 = vperm.xlu0 %2097, %v124_v12  }
  0x1a   :  { %224 = vperm.xlu1 %2098, %v1878_v13  }
  0x1b   :  { %219 = vperm.xlu0 %2097, %v1877_v14  }
  0x1c   :  { %10 = vsyncpa [#allocation3], 0  ;;  %v2099_v17 = vld [vmem:[%s2904_s3] sm:$0xff]   ;;  %vm554_vm0 = vcmask 261120   ;;  %v2907_v19 = vlaneseq  ;;  %v30_v25 = vld [vmem:[%s2901_s0 + $0x8] sm:$0x7] }
  0x1d   :  { %v2100_v18 = vld [vmem:[%s2904_s3 + $0x20] sm:$0xff]   ;;  %2002 = vmatprep.mubr.msk.bf16.mxu0 %vm554_vm0, %v2099_v17  ;;  %v31_v27 = vld [vmem:[%s2901_s0 + $0xc] sm:$0x7]  ;;  %v32_v28 = vld [vmem:[%s2901_s0 + $0x10] sm:$0x7]  ;;  %vm26_vm1 = vcmask 523264  }
  0x1e   :  { %345 = vperm.xlu1 %2098, %v1882_v15   ;;  %2014 = vmatprep.mubr.msk.bf16.mxu1 %vm554_vm0, %v2100_v18  ;;  %v2243_v20 = vshrl.u32 %v2907_v19, 7  ;;  %v28_v23 = vld [vmem:[%s2901_s0] sm:$0x7]  ;;  %v29_v24 = vld [vmem:[%s2901_s0 + $0x4] sm:$0x7]  ;;  %vm1515_vm2 = vcmask 130112  }
  0x1f   :  { %340 = vperm.xlu0 %2097, %v1881_v16   ;;  %v33_v31 = vld [vmem:[%s2901_s0 + $0x14] sm:$0x7]  ;;  %v34_v32 = vld [vmem:[%s2901_s0 + $0x18] sm:$0x7]  ;;  %v35_v33 = vld [vmem:[%s2901_s0 + $0x1c] sm:$0x7] }
  0x20   :  { %2930 = vst [vmem:[#allocation5_spill] sm:$0xff] %v2243_v20  ;;  %v42_v21 = vsub.s32 0, %v2243_v20  ;;  %v187_v22 = vsub.s32 1, %v2243_v20  ;;  %v308_v26 = vsub.s32 2, %v2243_v20  ;;  %vm1522_vm3 = vcmask 195712   ;;  %s2155_s22 = smov [#allocation2]  }
  0x21   :  { %vm1529_vm4 = vcmask 261312   ;;  %vm1536_vm5 = vcmask 326912   ;;  %vm1543_vm6 = vcmask 392512   ;;  %vm1550_vm7 = vcmask 458112   ;;  %s1869_s23 = sshll.u32 %s2155_s22, 4  ;;  %s1870_s23 = int_to_ptr.vmem [resolvable:$true] %s1869_s23 }
  0x22   :  { %v2263_v29 = vrot.slane %v28_v23, %v42_v21  ;;  %v2265_v30 = vrot.slane %v28_v23, %v187_v22  ;;  %v2276_v34 = vrot.slane %v29_v24, %v42_v21  ;;  %v2278_v35 = vrot.slane %v29_v24, %v187_v22  ;;  %s2131_s24 = scalar_lea.vmem %s1870_s23, 128  ;;  %p2136_p1 = scmp.lt.s32.totalorder %s1870_s23, %s1870_s23 }
  0x23   :  { %v2280_v36 = vrot.slane %v30_v25, %v42_v21  ;;  %v2282_v37 = vrot.slane %v30_v25, %v187_v22  ;;  %v2284_v38 = vrot.slane %v31_v27, %v42_v21  ;;  %v2286_v39 = vrot.slane %v31_v27, %v187_v22  ;;  %p2132_p0 = scmp.ne.s32.totalorder %s1870_s23, %s2131_s24  ;;  %p2137_p2 = scmp.lt.s32.totalorder %s2131_s24, %s2131_s24 }
  0x24   :  { %v2288_v40 = vrot.slane %v32_v28, %v42_v21  ;;  %v2290_v41 = vrot.slane %v32_v28, %v187_v22  ;;  %v2292_v42 = vrot.slane %v28_v23, %v308_v26  ;;  %v2294_v43 = vrot.slane %v33_v31, %v42_v21 }
  0x25   :  { %v2296_v44 = vrot.slane %v34_v32, %v42_v21  ;;  %v2298_v45 = vrot.slane %v35_v33, %v42_v21  ;;  %v2300_v46 = vrot.slane %v29_v24, %v308_v26  ;;  %v2302_v47 = vrot.slane %v30_v25, %v308_v26  ;;  %p2138_p3 = por %p2137_p2, %p2136_p1 }
  0x26   :  { %v2304_v48 = vrot.slane %v31_v27, %v308_v26  ;;  %v2306_v49 = vrot.slane %v33_v31, %v187_v22  ;;  %v2308_v52 = vrot.slane %v32_v28, %v308_v26  ;;  %v2310_v53 = vrot.slane %v33_v31, %v308_v26 }
  0x27   :  { %2931 = vst [vmem:[#allocation6_spill] sm:$0xff] %v2296_v44  ;;  %2932 = vst [vmem:[#allocation7_spill] sm:$0xff] %v2298_v45  ;;  %v2312_v54 = vrot.slane %v34_v32, %v187_v22  ;;  %v2314_v55 = vrot.slane %v35_v33, %v187_v22  ;;  %v2324_v2 = vrot.slane %v34_v32, %v308_v26  ;;  %vm1557_vm8 = vcmask 523712   ;;  %p2139_p4 = pnand %p2138_p3, %p2132_p0 }
  0x28   :  { %2933 = vst [vmem:[#allocation8_spill] sm:$0xff] %v2306_v49  ;;  %v2326_v3 = vrot.slane %v35_v33, %v308_v26  ;;  %vm1832_vm9 = vcmask 1041409   ;;  %vm1834_vm10 = vcmask 1042434   ;;  %vm1836_vm11 = vcmask 1043459  }
  0x29   :  { %2934 = vst [vmem:[#allocation9_spill] sm:$0xff] %v2312_v54  ;;  %2935 = vst [vmem:[#allocation10_spill] sm:$0xff] %v2314_v55  ;;  %vm1838_vm12 = vcmask 1044484   ;;  %vm1840_vm13 = vcmask 1045509   ;;  %vm1842_vm14 = vcmask 1046534   ;;  %vm1844_vm15 = vcmask 1047559  }
  0x2a   :  { %2936 = vst [vmem:[#allocation11_spill] sm:$0xff] %v2324_v2  ;;  %2937 = vst [vmem:[#allocation12_spill] sm:$0xff] %v2326_v3 }
  0x7d   :  { %v141_v50 = vpop.permute.xlu1 %140 }
  0x7e   :  { %v85_v51 = vpop.permute.xlu0 %84 }
  0x7f   :  { %v94_v56 = vmul.f32 %v85_v51, %v2263_v29  ;;  %v98_v57 = vmul.f32 %v85_v51, %v2276_v34  ;;  %v102_v58 = vmul.f32 %v85_v51, %v2280_v36  ;;  %v106_v59 = vmul.f32 %v85_v51, %v2284_v38 }
  0x80   :  { %v110_v60 = vmul.f32 %v85_v51, %v2288_v40  ;;  %v114_v61 = vmul.f32 %v85_v51, %v2294_v43  ;;  %v118_v62 = vmul.f32 %v85_v51, %v2296_v44  ;;  %v122_v63 = vmul.f32 %v85_v51, %v2298_v45 }
  0x81   :  { %v150_v0 = vadd.f32 %v141_v50, %v94_v56  ;;  %v154_v1 = vadd.f32 %v141_v50, %v98_v57  ;;  %v2328_v4 = vpop.permute.xlu1 %145  ;;  %v158_v6 = vadd.f32 %v141_v50, %v102_v58  ;;  %v162_v7 = vadd.f32 %v141_v50, %v106_v59 }
  0x82   :  { %2938 = vst [vmem:[#allocation13_spill] sm:$0xff] %v2328_v4  ;;  %v90_v5 = vpop.permute.xlu0 %89  ;;  %v2330_v8 = vadd.f32 %v141_v50, %v110_v60  ;;  %v2332_v9 = vadd.f32 %v141_v50, %v114_v61  ;;  %v2340_v16 = vadd.f32 %v141_v50, %v118_v62  ;;  %v2342_v17 = vadd.f32 %v141_v50, %v122_v63 }
  0x83   :  { %v95_v10 = vmul.f32 %v90_v5, %v2263_v29  ;;  %v99_v11 = vmul.f32 %v90_v5, %v2276_v34  ;;  %v103_v12 = vmul.f32 %v90_v5, %v2280_v36  ;;  %v107_v13 = vmul.f32 %v90_v5, %v2284_v38 }
  0x84   :  { %v111_v14 = vmul.f32 %v90_v5, %v2288_v40  ;;  %v115_v15 = vmul.f32 %v90_v5, %v2294_v43  ;;  %2939 = vst [vmem:[#allocation14_spill] sm:$0xff] %v2340_v16  ;;  %2940 = vst [vmem:[#allocation15_spill] sm:$0xff] %v2342_v17  ;;  %v2347_v22 = vmul.f32 %v90_v5, %v2296_v44 }
  0x85   :  { %v151_v18 = vadd.f32 %v2328_v4, %v95_v10  ;;  %v155_v21 = vadd.f32 %v2328_v4, %v99_v11  ;;  %v2350_v23 = vmul.f32 %v90_v5, %v2298_v45  ;;  %v2352_v24 = vpop.permute.xlu1 %234  ;;  %v159_v26 = vadd.f32 %v2328_v4, %v103_v12 }
  0x86   :  { %2941 = vst [vmem:[#allocation16_spill] sm:$0xff] %v2347_v22  ;;  %2943 = vst [vmem:[#allocation18_spill] sm:$0xff] %v2352_v24  ;;  %v2354_v25 = vpop.permute.xlu0 %229  ;;  %v163_v27 = vadd.f32 %v2328_v4, %v107_v13  ;;  %v2359_v28 = vadd.f32 %v2328_v4, %v111_v14  ;;  %v2362_v31 = vadd.f32 %v2328_v4, %v115_v15 }
  0x87   :  { %2942 = vst [vmem:[#allocation17_spill] sm:$0xff] %v2350_v23  ;;  %2944 = vst [vmem:[#allocation19_spill] sm:$0xff] %v2354_v25  ;;  %v239_v32 = vmul.f32 %v2354_v25, %v2265_v30  ;;  %v240_v33 = vmul.f32 %v2352_v24, %v2265_v30  ;;  %v243_v50 = vmul.f32 %v2354_v25, %v2278_v35 }
  0x88   :  { %v244_v51 = vmul.f32 %v2352_v24, %v2278_v35  ;;  %v247_v56 = vmul.f32 %v2354_v25, %v2282_v37  ;;  %v248_v57 = vmul.f32 %v2352_v24, %v2282_v37  ;;  %v251_v58 = vmul.f32 %v2354_v25, %v2286_v39 }
  0x89   :  { %v252_v59 = vmul.f32 %v2352_v24, %v2286_v39  ;;  %v271_v60 = vadd.f32 %v239_v32, %v150_v0  ;;  %v272_v61 = vadd.f32 %v240_v33, %v151_v18  ;;  %v275_v62 = vadd.f32 %v243_v50, %v154_v1  ;;  %v2380_v5 = vpop.permute.xlu1 %79 }
  0x8a   :  { %v276_v63 = vadd.f32 %v244_v51, %v155_v21  ;;  %2945 = vst [vmem:[#allocation20_spill] sm:$0xff] %v2380_v5  ;;  %v2382_v10 = vpop.permute.xlu0 %74  ;;  %v279_v11 = vadd.f32 %v247_v56, %v158_v6  ;;  %v280_v12 = vadd.f32 %v248_v57, %v159_v26  ;;  %v283_v13 = vadd.f32 %v251_v58, %v162_v7 }
  0x8b   :  { %2946 = vst [vmem:[#allocation21_spill] sm:$0xff] %v2382_v10  ;;  %v284_v14 = vadd.f32 %v252_v59, %v163_v27  ;;  %v92_v15 = vmul.f32 %v2382_v10, %v2263_v29  ;;  %v93_v19 = vmul.f32 %v2380_v5, %v2263_v29  ;;  %v96_v0 = vmul.f32 %v2382_v10, %v2276_v34 }
  0x8c   :  { %v97_v1 = vmul.f32 %v2380_v5, %v2276_v34  ;;  %v100_v18 = vmul.f32 %v2382_v10, %v2280_v36  ;;  %v101_v6 = vmul.f32 %v2380_v5, %v2280_v36  ;;  %v2398_v7 = vmul.f32 %v2382_v10, %v2284_v38 }
  0x8d   :  { %v2402_v21 = vmul.f32 %v2380_v5, %v2284_v38  ;;  %v2406_v29 = vmul.f32 %v2354_v25, %v2290_v41  ;;  %v2410_v34 = vmul.f32 %v2352_v24, %v2290_v41  ;;  %v2414_v26 = vmul.f32 %v2354_v25, %v2306_v49  ;;  %v2420_v27 = vpop.permute.xlu1 %355 }
  0x8e   :  { %v2418_v36 = vmul.f32 %v2352_v24, %v2306_v49  ;;  %v2422_v38 = vpop.permute.xlu0 %350  ;;  %v2426_v32 = vmul.f32 %v2382_v10, %v2288_v40  ;;  %v2430_v33 = vmul.f32 %v2380_v5, %v2288_v40  ;;  %v2434_v50 = vmul.f32 %v2382_v10, %v2294_v43 }
  0x8f   :  { %v2438_v51 = vmul.f32 %v2380_v5, %v2294_v43  ;;  %v360_v56 = vmul.f32 %v2422_v38, %v2292_v42  ;;  %v361_v57 = vmul.f32 %v2420_v27, %v2292_v42  ;;  %v364_v58 = vmul.f32 %v2422_v38, %v2300_v46 }
  0x90   :  { %v365_v40 = vmul.f32 %v2420_v27, %v2300_v46  ;;  %v368_v59 = vmul.f32 %v2422_v38, %v2302_v47  ;;  %v369_v20 = vmul.f32 %v2420_v27, %v2302_v47  ;;  %v372_v43 = vmul.f32 %v2422_v38, %v2304_v48 }
  0x91   :  { %2947 = vst [vmem:[#allocation22_spill] sm:$0xff] %v2438_v51  ;;  %v373_v45 = vmul.f32 %v2420_v27, %v2304_v48  ;;  %v392_v5 = vadd.f32 %v360_v56, %v271_v60  ;;  %v393_v10 = vadd.f32 %v361_v57, %v272_v61  ;;  %v396_v44 = vadd.f32 %v364_v58, %v275_v62  ;;  %v2456_v17 = vpop.permute.xlu1 %135 }
  0x92   :  { %v397_v3 = vadd.f32 %v365_v40, %v276_v63  ;;  %v2458_v55 = vpop.permute.xlu0 %130  ;;  %v400_v16 = vadd.f32 %v368_v59, %v279_v11  ;;  %v401_v23 = vadd.f32 %v369_v20, %v280_v12  ;;  %v404_v2 = vadd.f32 %v372_v43, %v283_v13 }
  0x93   :  { %v405_v24 = vadd.f32 %v373_v45, %v284_v14  ;;  %v424_v25 = vmax.f32 %v392_v5, 0.0  ;;  %v425_v54 = vmax.f32 %v393_v10, 0.0  ;;  %v428_v4 = vmax.f32 %v396_v44, 0.0 }
  0x94   :  { %v429_v22 = vmax.f32 %v397_v3, 0.0  ;;  %v148_v49 = vadd.f32 %v2458_v55, %v92_v15  ;;  %v149_v51 = vadd.f32 %v2456_v17, %v93_v19  ;;  %v152_v60 = vadd.f32 %v2458_v55, %v96_v0 }
  0x95   :  { %v153_v61 = vadd.f32 %v2456_v17, %v97_v1  ;;  %v519_v62 = vpack.c.bf16 %v425_v54, %v424_v25  ;;  %v432_v56 = vmax.f32 %v400_v16, 0.0  ;;  %v433_v57 = vmax.f32 %v401_v23, 0.0  ;;  %v2464_v11 = vpop.permute.xlu1 %224 }
  0x96   :  { %v521_v63 = vpack.c.bf16 %v429_v22, %v428_v4  ;;  %v2466_v20 = vpop.permute.xlu0 %219  ;;  %v436_v45 = vmax.f32 %v404_v2, 0.0  ;;  %v437_v5 = vmax.f32 %v405_v24, 0.0  ;;  %v156_v44 = vadd.f32 %v2458_v55, %v100_v18 }
  0x97   :  { %v157_v3 = vadd.f32 %v2456_v17, %v101_v6  ;;  %1998 = vmatprep.subr.bf16.mxu0 %v519_v62  ;;  %v237_v19 = vmul.f32 %v2466_v20, %v2265_v30  ;;  %v238_v54 = vmul.f32 %v2464_v11, %v2265_v30  ;;  %v241_v4 = vmul.f32 %v2466_v20, %v2278_v35 }
  0x98   :  { %2010 = vmatprep.subr.bf16.mxu1 %v521_v63  ;;  %1999 = vmatpush3.bf16.msra.mxu0 %v519_v62  ;;  %v242_v2 = vmul.f32 %v2464_v11, %v2278_v35  ;;  %v2478_v16 = vpack.c.bf16 %v433_v57, %v432_v56  ;;  %v2480_v22 = vpack.c.bf16 %v437_v5, %v436_v45 }
  0x99   :  { %2011 = vmatpush3.bf16.msra.mxu1 %v521_v63  ;;  %v269_v23 = vadd.f32 %v237_v19, %v148_v49  ;;  %v270_v24 = vadd.f32 %v238_v54, %v149_v51  ;;  %v273_v25 = vadd.f32 %v241_v4, %v152_v60  ;;  %v245_v10 = vmul.f32 %v2466_v20, %v2282_v37  ;;  %v2484_v12 = vpop.permute.xlu1 %345 }
  0x9a   :  { %v2486_v30 = vpop.permute.xlu0 %340  ;;  %v274_v13 = vadd.f32 %v242_v2, %v153_v61  ;;  %v246_v14 = vmul.f32 %v2464_v11, %v2282_v37  ;;  %v160_v35 = vadd.f32 %v2458_v55, %v2398_v7  ;;  %v161_v15 = vadd.f32 %v2456_v17, %v2402_v21 }
  0x9b   :  { %v358_v49 = vmul.f32 %v2486_v30, %v2292_v42  ;;  %v359_v0 = vmul.f32 %v2484_v12, %v2292_v42  ;;  %v362_v1 = vmul.f32 %v2486_v30, %v2300_v46  ;;  %v363_v18 = vmul.f32 %v2484_v12, %v2300_v46 }
  0x9c   :  { %v277_v6 = vadd.f32 %v245_v10, %v156_v44  ;;  %v278_v37 = vadd.f32 %v246_v14, %v157_v3  ;;  %v366_v7 = vmul.f32 %v2486_v30, %v2302_v47  ;;  %v367_v21 = vmul.f32 %v2484_v12, %v2302_v47 }
  0x9d   :  { %v390_v51 = vadd.f32 %v358_v49, %v269_v23  ;;  %v391_v58 = vadd.f32 %v359_v0, %v270_v24  ;;  %v394_v40 = vadd.f32 %v362_v1, %v273_v25  ;;  %v395_v59 = vadd.f32 %v363_v18, %v274_v13  ;;  %v2101_v24 = vld [vmem:[%s2904_s3 + $0x8] sm:$0xff]  }
  0x9e   :  { %v398_v43 = vadd.f32 %v366_v7, %v277_v6  ;;  %v399_v42 = vadd.f32 %v367_v21, %v278_v37  ;;  %v249_v60 = vmul.f32 %v2466_v20, %v2286_v39  ;;  %v250_v46 = vmul.f32 %v2464_v11, %v2286_v39 }
  0x9f   :  { %v422_v61 = vmax.f32 %v390_v51, 0.0  ;;  %v423_v62 = vmax.f32 %v391_v58, 0.0  ;;  %v426_v63 = vmax.f32 %v394_v40, 0.0  ;;  %v427_v56 = vmax.f32 %v395_v59, 0.0 }
  0xa0   :  { %v430_v57 = vmax.f32 %v398_v43, 0.0  ;;  %v431_v45 = vmax.f32 %v399_v42, 0.0  ;;  %v281_v5 = vadd.f32 %v249_v60, %v160_v35  ;;  %v282_v47 = vadd.f32 %v250_v46, %v161_v15  ;;  %v2105_v42 = vld [vmem:[%s2904_s3 + $0x18] sm:$0xff]   ;;  %v2949_v46 = vld [vmem:[#allocation8_spill] sm:$0xff] }
  0xa1   :  { %v518_v44 = vpack.c.bf16 %v423_v62, %v422_v61  ;;  %v520_v3 = vpack.c.bf16 %v427_v56, %v426_v63  ;;  %v370_v19 = vmul.f32 %v2486_v30, %v2304_v48  ;;  %v371_v54 = vmul.f32 %v2484_v12, %v2304_v48  ;;  %v2102_v48 = vld [vmem:[%s2904_s3 + $0x28] sm:$0xff]   ;;  %v2107_v56 = vld [vmem:[%s2904_s3 + $0x40] sm:$0xff]  }
  0xa2   :  { %v522_v4 = vpack.c.bf16 %v431_v45, %v430_v57  ;;  %v287_v39 = vadd.f32 %v2406_v29, %v2330_v8  ;;  %v288_v2 = vadd.f32 %v2410_v34, %v2359_v28  ;;  %v376_v23 = vmul.f32 %v2422_v38, %v2308_v52  ;;  %v2108_v57 = vld [vmem:[%s2904_s3 + $0x60] sm:$0xff]  }
  0xa3   :  { %2000 = vmatprep.subr.bf16.mxu0 %v518_v44  ;;  %2012 = vmatprep.subr.bf16.mxu1 %v520_v3  ;;  %v402_v25 = vadd.f32 %v370_v19, %v281_v5  ;;  %v403_v10 = vadd.f32 %v371_v54, %v282_v47  ;;  %v377_v8 = vmul.f32 %v2420_v27, %v2308_v52  ;;  %v2951_v19 = vld [vmem:[#allocation13_spill] sm:$0xff] }
  0xa4   :  { %2001 = vmatpush3.bf16.msra.mxu0 %v518_v44  ;;  %2013 = vmatpush3.bf16.msra.mxu1 %v520_v3  ;;  %v408_v28 = vadd.f32 %v376_v23, %v287_v39  ;;  %v291_v29 = vadd.f32 %v2414_v26, %v2332_v9  ;;  %v292_v34 = vadd.f32 %v2418_v36, %v2362_v31  ;;  %v2103_v9 = vld [vmem:[%s2904_s3 + $0x10] sm:$0xff]   ;;  %v2950_v3 = vld [vmem:[#allocation16_spill] sm:$0xff]  ;;  %v2953_v39 = vld [vmem:[#allocation19_spill] sm:$0xff] }
  0xa5   :  { %2022 = vmatprep.subr.bf16.mxu0 %v2478_v16  ;;  %2034 = vmatprep.subr.bf16.mxu1 %v2480_v22  ;;  %v434_v13 = vmax.f32 %v402_v25, 0.0  ;;  %v435_v14 = vmax.f32 %v403_v10, 0.0  ;;  %v409_v35 = vadd.f32 %v377_v8, %v288_v2  ;;  %v380_v15 = vmul.f32 %v2422_v38, %v2310_v53  ;;  %v2104_v31 = vld [vmem:[%s2904_s3 + $0x30] sm:$0xff]   ;;  %v2956_v10 = vld [vmem:[#allocation17_spill] sm:$0xff] }
  0xa6   :  { %v440_v49 = vmax.f32 %v408_v28, 0.0  ;;  %v381_v0 = vmul.f32 %v2420_v27, %v2310_v53  ;;  %v164_v26 = vadd.f32 %v2458_v55, %v2426_v32  ;;  %v165_v36 = vadd.f32 %v2456_v17, %v2430_v33  ;;  %v2954_v23 = vld [vmem:[#allocation18_spill] sm:$0xff] }
  0xa7   :  { %2003 = vmatmul.mubr.msk.bf16.vlgmr.msra.gmra.mxu0 %vm554_vm0, %v2101_v24  ;;  %2015 = vmatmul.mubr.msk.bf16.vlgmr.msra.gmra.mxu1 %vm554_vm0, %v2102_v48  ;;  %v524_v1 = vpack.c.bf16 %v435_v14, %v434_v13  ;;  %v441_v18 = vmax.f32 %v409_v35, 0.0  ;;  %v412_v6 = vadd.f32 %v380_v15, %v291_v29  ;;  %v253_v37 = vmul.f32 %v2466_v20, %v2290_v41  ;;  %v2955_v48 = vld [vmem:[#allocation11_spill] sm:$0xff] }
  0xa8   :  { %2023 = vmatpush3.bf16.msra.mxu0 %v2478_v16  ;;  %2035 = vmatpush3.bf16.msra.mxu1 %v2480_v22  ;;  %v413_v7 = vadd.f32 %v381_v0, %v292_v34  ;;  %v254_v32 = vmul.f32 %v2464_v11, %v2290_v41  ;;  %v374_v33 = vmul.f32 %v2486_v30, %v2308_v52  ;;  %v2948_v22 = vld [vmem:[#allocation22_spill] sm:$0xff] }
  0xa9   :  { %2024 = vmatprep.subr.bf16.mxu0 %v522_v4  ;;  %2036 = vmatprep.subr.bf16.mxu1 %v524_v1  ;;  %v2558_v21 = vpack.c.bf16 %v441_v18, %v440_v49  ;;  %v444_v51 = vmax.f32 %v412_v6, 0.0  ;;  %v285_v58 = vadd.f32 %v253_v37, %v164_v26  ;;  %v375_v40 = vmul.f32 %v2484_v12, %v2308_v52  ;;  %v2106_v52 = vld [vmem:[%s2904_s3 + $0x38] sm:$0xff]   ;;  %v2957_v34 = vld [vmem:[#allocation14_spill] sm:$0xff]  ;;  %v2960_v37 = vld [vmem:[#allocation12_spill] sm:$0xff] }
  0xaa   :  { %v445_v59 = vmax.f32 %v413_v7, 0.0  ;;  %2006 = vmatprep.mubr.msk.bf16.mxu0 %vm554_vm0, %v2103_v9  ;;  %2018 = vmatprep.mubr.msk.bf16.mxu1 %vm554_vm0, %v2104_v31  ;;  %v286_v16 = vadd.f32 %v254_v32, %v165_v36  ;;  %v168_v41 = vadd.f32 %v2458_v55, %v2434_v50  ;;  %v169_v43 = vadd.f32 %v2456_v17, %v2948_v22  ;;  %v2958_v49 = vld [vmem:[#allocation10_spill] sm:$0xff]  ;;  %v2959_v18 = vld [vmem:[#allocation15_spill] sm:$0xff] }
  0xab   :  { %v406_v60 = vadd.f32 %v374_v33, %v285_v58  ;;  %v257_v61 = vmul.f32 %v2466_v20, %v2949_v46  ;;  %v258_v62 = vmul.f32 %v2464_v11, %v2949_v46  ;;  %v378_v50 = vmul.f32 %v2486_v30, %v2310_v53  ;;  %v2109_v33 = vld [vmem:[%s2904_s3 + $0x48] sm:$0xff]   ;;  %v2961_v22 = vld [vmem:[#allocation6_spill] sm:$0xff] }
  0xac   :  { %2025 = vmatpush3.bf16.msra.mxu0 %v522_v4  ;;  %2037 = vmatpush3.bf16.msra.mxu1 %v524_v1  ;;  %v529_v63 = vpack.c.bf16 %v445_v59, %v444_v51  ;;  %v407_v45 = vadd.f32 %v375_v40, %v286_v16  ;;  %v379_v5 = vmul.f32 %v2484_v12, %v2310_v53  ;;  %v2952_v4 = vld [vmem:[#allocation9_spill] sm:$0xff]  ;;  %v2112_v46 = vld [vmem:[%s2904_s3 + $0x70] sm:$0xff]  }
  0xad   :  { %2046 = vmatprep.subr.bf16.mxu0 %v2558_v21  ;;  %v289_v47 = vadd.f32 %v257_v61, %v168_v41  ;;  %v290_v44 = vadd.f32 %v258_v62, %v169_v43  ;;  %v175_v54 = vadd.f32 %v2951_v19, %v2950_v3  ;;  %v263_v2 = vmul.f32 %v2953_v39, %v2952_v4  ;;  %v2110_v51 = vld [vmem:[%s2904_s3 + $0x68] sm:$0xff]   ;;  %v2963_v61 = vld [vmem:[#allocation20_spill] sm:$0xff] }
  0xae   :  { %2058 = vmatprep.subr.bf16.mxu1 %v529_v63  ;;  %v264_v24 = vmul.f32 %v2954_v23, %v2952_v4  ;;  %v384_v25 = vmul.f32 %v2422_v38, %v2955_v48  ;;  %v385_v53 = vmul.f32 %v2420_v27, %v2955_v48  ;;  %v179_v8 = vadd.f32 %v2951_v19, %v2956_v10  ;;  %v2962_v43 = vld [vmem:[#allocation21_spill] sm:$0xff] }
  0xaf   :  { %2007 = vmatmul.mubr.msk.bf16.gmra.mxu0 %vm554_vm0, %v2105_v42  ;;  %2019 = vmatmul.mubr.msk.bf16.gmra.mxu1 %vm554_vm0, %v2106_v52  ;;  %v410_v28 = vadd.f32 %v378_v50, %v289_v47  ;;  %v411_v29 = vadd.f32 %v379_v5, %v290_v44  ;;  %v295_v13 = vadd.f32 %v263_v2, %v2957_v34  ;;  %v438_v14 = vmax.f32 %v406_v60, 0.0  ;;  %v2964_v44 = vld [vmem:[#allocation7_spill] sm:$0xff]  ;;  %v2117_v34 = vld [vmem:[%s2904_s3 + $0x88] sm:$0xff]  }
  0xb0   :  { %2026 = vmatprep.mubr.msk.bf16.mxu0 %vm554_vm0, %v2107_v56  ;;  %2038 = vmatprep.mubr.msk.bf16.mxu1 %vm554_vm0, %v2108_v57  ;;  %v439_v35 = vmax.f32 %v407_v45, 0.0  ;;  %v296_v15 = vadd.f32 %v264_v24, %v175_v54  ;;  %v267_v0 = vmul.f32 %v2953_v39, %v2958_v49  ;;  %v268_v36 = vmul.f32 %v2954_v23, %v2958_v49  ;;  %v2113_v2 = vld [vmem:[%s2904_s3 + $0x58] sm:$0xff]  }
  0xb1   :  { %v442_v9 = vmax.f32 %v410_v28, 0.0  ;;  %v443_v31 = vmax.f32 %v411_v29, 0.0  ;;  %v416_v26 = vadd.f32 %v384_v25, %v295_v13  ;;  %v388_v7 = vmul.f32 %v2422_v38, %v2960_v37  ;;  %v2118_v13 = vld [vmem:[%s2904_s3 + $0xa8] sm:$0xff]  }
  0xb2   :  { %v417_v1 = vadd.f32 %v385_v53, %v296_v15  ;;  %v299_v6 = vadd.f32 %v267_v0, %v2959_v18  ;;  %v389_v32 = vmul.f32 %v2420_v27, %v2960_v37  ;;  %v300_v58 = vadd.f32 %v268_v36, %v179_v8  ;;  %v2111_v27 = vld [vmem:[%s2904_s3 + $0x50] sm:$0xff]   ;;  %v2116_v53 = vld [vmem:[%s2904_s3 + $0xa0] sm:$0xff]   ;;  %v2120_v36 = vld [vmem:[%s2904_s3 + $0x98] sm:$0xff]  }
  0xb3   :  { %v448_v40 = vmax.f32 %v416_v26, 0.0  ;;  %v116_v42 = vmul.f32 %v2962_v43, %v2961_v22  ;;  %v526_v38 = vpack.c.bf16 %v439_v35, %v438_v14  ;;  %v528_v52 = vpack.c.bf16 %v443_v31, %v442_v9  ;;  %v2119_v0 = vld [vmem:[%s2904_s3 + $0x90] sm:$0xff]   ;;  %v2123_v18 = vld [vmem:[%s2904_s3 + $0xc0] sm:$0xff]  }
  0xb4   :  { %v449_v59 = vmax.f32 %v417_v1, 0.0  ;;  %v420_v16 = vadd.f32 %v388_v7, %v299_v6  ;;  %v421_v41 = vadd.f32 %v389_v32, %v300_v58  ;;  %v117_v62 = vmul.f32 %v2963_v61, %v2961_v22  ;;  %v2121_v9 = vld [vmem:[%s2904_s3 + $0xb0] sm:$0xff]   ;;  %v2122_v1 = vld [vmem:[%s2904_s3 + $0xb8] sm:$0xff]   ;;  %v2125_v6 = vld [vmem:[%s2904_s3 + $0xe0] sm:$0xff]  }
  0xb5   :  { %v172_v56 = vadd.f32 %v2458_v55, %v116_v42  ;;  %v261_v57 = vmul.f32 %v2466_v20, %v2952_v4  ;;  %v262_v45 = vmul.f32 %v2464_v11, %v2952_v4  ;;  %v382_v47 = vmul.f32 %v2486_v30, %v2955_v48  ;;  %v2126_v7 = vld [vmem:[%s2904_s3 + $0xe8] sm:$0xff]   ;;  %v2127_v32 = vld [vmem:[%s2904_s3 + $0xd0] sm:$0xff]   ;;  %v2130_v58 = vld [vmem:[%s2904_s3 + $0xf8] sm:$0xff]  }
  0xb6   :  { %v452_v60 = vmax.f32 %v420_v16, 0.0  ;;  %v453_v50 = vmax.f32 %v421_v41, 0.0  ;;  %v531_v5 = vpack.c.bf16 %v449_v59, %v448_v40  ;;  %v120_v3 = vmul.f32 %v2962_v43, %v2964_v44 }
  0xb7   :  { %2027 = vmatmul.mubr.msk.bf16.vlgmr.msra.gmra.mxu0 %vm554_vm0, %v2109_v33  ;;  %2039 = vmatmul.mubr.msk.bf16.vlgmr.msra.gmra.mxu1 %vm554_vm0, %v2110_v51  ;;  %v121_v19 = vmul.f32 %v2963_v61, %v2964_v44  ;;  %v265_v54 = vmul.f32 %v2466_v20, %v2958_v49  ;;  %v266_v4 = vmul.f32 %v2464_v11, %v2958_v49  ;;  %v2114_v20 = vld [vmem:[%s2904_s3 + $0x78] sm:$0xff]   ;;  %v2129_v33 = vld [vmem:[%s2904_s3 + $0xf0] sm:$0xff]  }
  0xb8   :  { %2047 = vmatpush3.bf16.msra.mxu0 %v2558_v21  ;;  %2059 = vmatpush3.bf16.msra.mxu1 %v529_v63  ;;  %v533_v21 = vpack.c.bf16 %v453_v50, %v452_v60  ;;  %v173_v63 = vadd.f32 %v2456_v17, %v117_v62  ;;  %v383_v39 = vmul.f32 %v2484_v12, %v2955_v48  ;;  %v2115_v48 = vld [vmem:[%s2904_s3 + $0x80] sm:$0xff]   ;;  %v2128_v51 = vld [vmem:[%s2904_s3 + $0xd8] sm:$0xff]  }
  0xb9   :  { %2048 = vmatprep.subr.bf16.mxu0 %v526_v38  ;;  %2060 = vmatprep.subr.bf16.mxu1 %v528_v52  ;;  %v176_v11 = vadd.f32 %v2458_v55, %v120_v3  ;;  %v177_v23 = vadd.f32 %v2456_v17, %v121_v19  ;;  %v386_v24 = vmul.f32 %v2486_v30, %v2960_v37 }
  0xba   :  { %2030 = vmatprep.mubr.msk.bf16.mxu0 %vm554_vm0, %v2111_v27  ;;  %2042 = vmatprep.mubr.msk.bf16.mxu1 %vm554_vm0, %v2112_v46  ;;  %v387_v25 = vmul.f32 %v2484_v12, %v2960_v37  ;;  %v293_v10 = vadd.f32 %v261_v57, %v172_v56  ;;  %v294_v55 = vadd.f32 %v262_v45, %v173_v63  ;;  %v2124_v37 = vld [vmem:[%s2904_s3 + $0xc8] sm:$0xff]  }
  0xbb   :  { %v297_v17 = vadd.f32 %v265_v54, %v176_v11  ;;  %v298_v8 = vadd.f32 %v266_v4, %v177_v23 }
  0xbc   :  { %2049 = vmatpush3.bf16.msra.mxu0 %v526_v38  ;;  %2061 = vmatpush3.bf16.msra.mxu1 %v528_v52  ;;  %v414_v30 = vadd.f32 %v382_v47, %v293_v10  ;;  %v415_v12 = vadd.f32 %v383_v39, %v294_v55 }
  0xbd   :  { %2070 = vmatprep.subr.bf16.mxu0 %v531_v5  ;;  %2082 = vmatprep.subr.bf16.mxu1 %v533_v21  ;;  %v418_v28 = vadd.f32 %v386_v24, %v297_v17  ;;  %v419_v29 = vadd.f32 %v387_v25, %v298_v8 }
  0xbe   :  { %v446_v14 = vmax.f32 %v414_v30, 0.0  ;;  %v447_v35 = vmax.f32 %v415_v12, 0.0 }
  0xbf   :  { %2031 = vmatmul.mubr.msk.bf16.gmra.mxu0 %vm554_vm0, %v2113_v2  ;;  %2043 = vmatmul.mubr.msk.bf16.gmra.mxu1 %vm554_vm0, %v2114_v20  ;;  %v450_v15 = vmax.f32 %v418_v28, 0.0  ;;  %v451_v49 = vmax.f32 %v419_v29, 0.0 }
  0xc0   :  { %2050 = vmatprep.mubr.msk.bf16.mxu0 %vm554_vm0, %v2115_v48  ;;  %2062 = vmatprep.mubr.msk.bf16.mxu1 %vm554_vm0, %v2116_v53  ;;  %v530_v31 = vpack.c.bf16 %v447_v35, %v446_v14 }
  0xc1   :  { %v532_v26 = vpack.c.bf16 %v451_v49, %v450_v15 }
  0xc7   :  { %2051 = vmatmul.mubr.msk.bf16.vlgmr.msra.gmra.mxu0 %vm554_vm0, %v2117_v34  ;;  %2063 = vmatmul.mubr.msk.bf16.vlgmr.msra.gmra.mxu1 %vm554_vm0, %v2118_v13 }
  0xc8   :  { %2071 = vmatpush3.bf16.msra.mxu0 %v531_v5  ;;  %2083 = vmatpush3.bf16.msra.mxu1 %v533_v21 }
  0xc9   :  { %2072 = vmatprep.subr.bf16.mxu0 %v530_v31  ;;  %2084 = vmatprep.subr.bf16.mxu1 %v532_v26 }
  0xca   :  { %2054 = vmatprep.mubr.msk.bf16.mxu0 %vm554_vm0, %v2119_v0  ;;  %2066 = vmatprep.mubr.msk.bf16.mxu1 %vm554_vm0, %v2121_v9 }
  0xcc   :  { %2073 = vmatpush3.bf16.msra.mxu0 %v530_v31  ;;  %2085 = vmatpush3.bf16.msra.mxu1 %v532_v26 }
  0xcf   :  { %2055 = vmatmul.mubr.msk.bf16.gmra.mxu0 %vm554_vm0, %v2120_v36  ;;  %2067 = vmatmul.mubr.msk.bf16.gmra.mxu1 %vm554_vm0, %v2122_v1 }
  0xd0   :  { %2074 = vmatprep.mubr.msk.bf16.mxu0 %vm554_vm0, %v2123_v18  ;;  %2086 = vmatprep.mubr.msk.bf16.mxu1 %vm554_vm0, %v2125_v6 }
  0xd7   :  { %2075 = vmatmul.mubr.msk.bf16.vlgmr.msra.gmra.mxu0 %vm554_vm0, %v2124_v37  ;;  %2087 = vmatmul.mubr.msk.bf16.vlgmr.msra.gmra.mxu1 %vm554_vm0, %v2126_v7 }
  0xd8   :  { %2078 = vmatprep.mubr.msk.bf16.mxu0 %vm554_vm0, %v2127_v32  ;;  %2090 = vmatprep.mubr.msk.bf16.mxu1 %vm554_vm0, %v2129_v33 }
  0xdf   :  { %2079 = vmatmul.mubr.msk.bf16.gmra.mxu0 %vm554_vm0, %v2128_v51  ;;  %2091 = vmatmul.mubr.msk.bf16.gmra.mxu1 %vm554_vm0, %v2130_v58 }
 0x167   :  { %v2004_v40 = vpop.f32.mrf.mxu0  ;;  %v2016_v59 = vpop.f32.mrf.mxu1 }
 0x168   :  { %1332 = vmax.xlane.f32.xlu1 %v2016_v59  ;;  %1316 = vmax.xlane.f32.xlu0 %v2004_v40  ;;  %v2965_v40 = vlaneseq }
 0x169   :  { %v601_v16 = vpop.f32.mrf.mxu0  ;;  %v698_v41 = vpop.f32.mrf.mxu1 }
 0x16a   :  { %v1505_v59 = vand.u32 127, %v2965_v40 }
 0x16b   :  { %v2005_v22 = vpop.f32.mrf.mxu0  ;;  %v2017_v43 = vpop.f32.mrf.mxu1 }
 0x16c   :  { %1328 = vmax.xlane.f32.xlu1 %v698_v41  ;;  %1312 = vmax.xlane.f32.xlu0 %v601_v16 }
 0x16d   :  { %v604_v42 = vpop.f32.mrf.mxu0  ;;  %v701_v38 = vpop.f32.mrf.mxu1 }
 0x16f   :  { %v2008_v52 = vpop.f32.mrf.mxu0  ;;  %v2020_v60 = vpop.f32.mrf.mxu1 }
 0x170   :  { %1318 = vmax.xlane.f32.xlu0 %v2005_v22  ;;  %1314 = vmax.xlane.f32.xlu1 %v604_v42  ;;  %v1510_v22 = vadd.s32 4294967288, %v1505_v59  ;;  %v1524_v42 = vadd.s32 4294967272, %v1505_v59 }
 0x171   :  { %v617_v27 = vpop.f32.mrf.mxu0  ;;  %v714_v46 = vpop.f32.mrf.mxu1 }
 0x173   :  { %v2009_v61 = vpop.f32.mrf.mxu0  ;;  %v2021_v62 = vpop.f32.mrf.mxu1 }
 0x174   :  { %1334 = vmax.xlane.f32.xlu0 %v2017_v43  ;;  %1324 = vmax.xlane.f32.xlu1 %v2008_v52  ;;  %v1517_v43 = vadd.s32 4294967280, %v1505_v59 }
 0x175   :  { %v620_v50 = vpop.f32.mrf.mxu0  ;;  %v717_v56 = vpop.f32.mrf.mxu1 }
 0x177   :  { %v2040_v57 = vpop.f32.mrf.mxu1  ;;  %v2028_v45 = vpop.f32.mrf.mxu0 }
 0x178   :  { %1330 = vmax.xlane.f32.xlu0 %v701_v38  ;;  %1340 = vmax.xlane.f32.xlu1 %v2020_v60  ;;  %v2966_v60 = vld [vmem:[#allocation5_spill] sm:$0xff] }
 0x179   :  { %v892_v5 = vpop.f32.mrf.mxu1  ;;  %v795_v47 = vpop.f32.mrf.mxu0 }
 0x17b   :  { %v2029_v44 = vpop.f32.mrf.mxu0  ;;  %v2041_v3 = vpop.f32.mrf.mxu1 }
 0x17c   :  { %1320 = vmax.xlane.f32.xlu1 %v617_v27  ;;  %1326 = vmax.xlane.f32.xlu0 %v2009_v61  ;;  %v2734_v27 = vsub.s32 %v1505_v59, %v2966_v60  ;;  %v2154_v61 = vmov -inf  }
 0x17d   :  { %v798_v19 = vpop.f32.mrf.mxu0  ;;  %v895_v54 = vpop.f32.mrf.mxu1  ;;  %27 = vst.msk [vmem:[#allocation2] sm:$0xff] %vm26_vm1, %v2154_v61 }
 0x17f   :  { %v2032_v4 = vpop.f32.mrf.mxu0  ;;  %v2044_v21 = vpop.f32.mrf.mxu1 }
 0x180   :  { %1336 = vmax.xlane.f32.xlu1 %v714_v46  ;;  %1342 = vmax.xlane.f32.xlu0 %v2021_v62  ;;  %v2737_v46 = vsub.s32 %v1510_v22, %v2966_v60  ;;  %v2741_v62 = vsub.s32 %v1517_v43, %v2966_v60 }
 0x181   :  { %v811_v63 = vpop.f32.mrf.mxu0  ;;  %v908_v39 = vpop.f32.mrf.mxu1 }
 0x183   :  { %v2033_v2 = vpop.f32.mrf.mxu0  ;;  %v2045_v20 = vpop.f32.mrf.mxu1 }
 0x184   :  { %1360 = vmax.xlane.f32.xlu1 %v892_v5  ;;  %1322 = vmax.xlane.f32.xlu0 %v620_v50  ;;  %v2744_v50 = vsub.s32 %v1524_v42, %v2966_v60 }
 0x185   :  { %v814_v11 = vpop.f32.mrf.mxu0  ;;  %v911_v23 = vpop.f32.mrf.mxu1 }
 0x187   :  { %v2052_v24 = vpop.f32.mrf.mxu0  ;;  %v2064_v25 = vpop.f32.mrf.mxu1 }
 0x188   :  { %1338 = vmax.xlane.f32.xlu0 %v717_v56  ;;  %1350 = vmax.xlane.f32.xlu1 %v2029_v44 }
 0x189   :  { %v1086_v48 = vpop.f32.mrf.mxu1  ;;  %v989_v53 = vpop.f32.mrf.mxu0 }
 0x18b   :  { %v2065_v10 = vpop.f32.mrf.mxu1  ;;  %v2053_v55 = vpop.f32.mrf.mxu0 }
 0x18c   :  { %1348 = vmax.xlane.f32.xlu0 %v2028_v45  ;;  %1346 = vmax.xlane.f32.xlu1 %v798_v19 }
 0x18d   :  { %v1089_v17 = vpop.f32.mrf.mxu1  ;;  %v992_v8 = vpop.f32.mrf.mxu0 }
 0x18f   :  { %v2056_v30 = vpop.f32.mrf.mxu0  ;;  %v2068_v28 = vpop.f32.mrf.mxu1 }
 0x190   :  { %1364 = vmax.xlane.f32.xlu0 %v2040_v57  ;;  %1356 = vmax.xlane.f32.xlu1 %v2032_v4 }
 0x191   :  { %v1005_v12 = vpop.f32.mrf.mxu0  ;;  %v1102_v34 = vpop.f32.mrf.mxu1 }
 0x193   :  { %v2057_v29 = vpop.f32.mrf.mxu0  ;;  %v2069_v14 = vpop.f32.mrf.mxu1 }
 0x194   :  { %1344 = vmax.xlane.f32.xlu0 %v795_v47  ;;  %1372 = vmax.xlane.f32.xlu1 %v2044_v21 }
 0x195   :  { %v1008_v13 = vpop.f32.mrf.mxu0  ;;  %v1105_v15 = vpop.f32.mrf.mxu1 }
 0x197   :  { %v2076_v35 = vpop.f32.mrf.mxu0  ;;  %v2088_v0 = vpop.f32.mrf.mxu1 }
 0x198   :  { %1366 = vmax.xlane.f32.xlu0 %v2041_v3  ;;  %1352 = vmax.xlane.f32.xlu1 %v811_v63  ;;  %v1531_v63 = vadd.s32 4294967264, %v1505_v59 }
 0x199   :  { %v1183_v49 = vpop.f32.mrf.mxu0  ;;  %v1280_v31 = vpop.f32.mrf.mxu1 }
 0x19b   :  { %v2077_v9 = vpop.f32.mrf.mxu0  ;;  %v2089_v36 = vpop.f32.mrf.mxu1 }
 0x19c   :  { %1362 = vmax.xlane.f32.xlu0 %v895_v54  ;;  %1368 = vmax.xlane.f32.xlu1 %v908_v39 }
 0x19d   :  { %v1186_v26 = vpop.f32.mrf.mxu0  ;;  %v1283_v18 = vpop.f32.mrf.mxu1 }
 0x19f   :  { %v2080_v1 = vpop.f32.mrf.mxu0  ;;  %v2092_v37 = vpop.f32.mrf.mxu1 }
 0x1a0   :  { %1358 = vmax.xlane.f32.xlu0 %v2033_v2  ;;  %1380 = vmax.xlane.f32.xlu1 %v2052_v24 }
 0x1a1   :  { %v1199_v6 = vpop.f32.mrf.mxu0  ;;  %v1296_v32 = vpop.f32.mrf.mxu1 }
 0x1a3   :  { %v2081_v7 = vpop.f32.mrf.mxu0  ;;  %v2093_v51 = vpop.f32.mrf.mxu1 }
 0x1a4   :  { %1374 = vmax.xlane.f32.xlu0 %v2045_v20  ;;  %1396 = vmax.xlane.f32.xlu1 %v2064_v25 }
 0x1a5   :  { %v1202_v33 = vpop.f32.mrf.mxu0  ;;  %v1299_v58 = vpop.f32.mrf.mxu1 }
 0x1a8   :  { %1354 = vmax.xlane.f32.xlu0 %v814_v11  ;;  %1376 = vmax.xlane.f32.xlu1 %v989_v53 }
 0x1ac   :  { %1370 = vmax.xlane.f32.xlu0 %v911_v23  ;;  %1394 = vmax.xlane.f32.xlu1 %v1089_v17  ;;  %v2756_v23 = vsub.s32 %v1531_v63, %v2966_v60 }
 0x1b0   :  { %1392 = vmax.xlane.f32.xlu0 %v1086_v48  ;;  %1388 = vmax.xlane.f32.xlu1 %v2056_v30  ;;  %v1538_v30 = vadd.s32 4294967256, %v1505_v59 }
 0x1b4   :  { %1382 = vmax.xlane.f32.xlu0 %v2053_v55  ;;  %1384 = vmax.xlane.f32.xlu1 %v1005_v12  ;;  %v1545_v12 = vadd.s32 4294967248, %v1505_v59 }
 0x1b8   :  { %1398 = vmax.xlane.f32.xlu0 %v2065_v10  ;;  %1400 = vmax.xlane.f32.xlu1 %v1102_v34 }
 0x1bc   :  { %1378 = vmax.xlane.f32.xlu0 %v992_v8  ;;  %1390 = vmax.xlane.f32.xlu1 %v2057_v29  ;;  %v1552_v29 = vadd.s32 4294967240, %v1505_v59 }
 0x1c0   :  { %1404 = vmax.xlane.f32.xlu0 %v2068_v28  ;;  %1406 = vmax.xlane.f32.xlu1 %v2069_v14 }
 0x1c4   :  { %1386 = vmax.xlane.f32.xlu0 %v1008_v13  ;;  %1412 = vmax.xlane.f32.xlu1 %v2076_v35  ;;  %v2767_v35 = vsub.s32 %v1538_v30, %v2966_v60 }
 0x1c8   :  { %1402 = vmax.xlane.f32.xlu0 %v1105_v15  ;;  %1428 = vmax.xlane.f32.xlu1 %v2088_v0  ;;  %v2770_v15 = vsub.s32 %v1545_v12, %v2966_v60 }
 0x1cc   :  { %1408 = vmax.xlane.f32.xlu0 %v1183_v49  ;;  %1410 = vmax.xlane.f32.xlu1 %v1186_v26  ;;  %v2773_v49 = vsub.s32 %v1552_v29, %v2966_v60 }
 0x1d0   :  { %1424 = vmax.xlane.f32.xlu0 %v1280_v31  ;;  %1426 = vmax.xlane.f32.xlu1 %v1283_v18 }
 0x1d4   :  { %1414 = vmax.xlane.f32.xlu0 %v2077_v9  ;;  %1416 = vmax.xlane.f32.xlu1 %v1199_v6 }
 0x1d8   :  { %1430 = vmax.xlane.f32.xlu0 %v2089_v36  ;;  %1418 = vmax.xlane.f32.xlu1 %v1202_v33 }
 0x1dc   :  { %1420 = vmax.xlane.f32.xlu0 %v2080_v1  ;;  %1434 = vmax.xlane.f32.xlu1 %v1299_v58 }
 0x1e0   :  { %1432 = vmax.xlane.f32.xlu0 %v1296_v32  ;;  %1436 = vmax.xlane.f32.xlu1 %v2092_v37 }
 0x1e4   :  { %1422 = vmax.xlane.f32.xlu0 %v2081_v7 }
 0x1e8   :  { %1438 = vmax.xlane.f32.xlu0 %v2093_v51 }
 0x1f1   :  { %v1333_v16 = vpop.xlane.xlu1 %1332  ;;  %v1317_v41 = vpop.xlane.xlu0 %1316 }
 0x1f2   :  { %v1521_v47 = vrot.slane %v1317_v41, %v2741_v62  ;;  %v1571_v24 = vrot.slane %v1333_v16, %v2741_v62 }
 0x1f5   :  { %v1329_v38 = vpop.xlane.xlu1 %1328  ;;  %v1313_v52 = vpop.xlane.xlu0 %1312 }
 0x1f6   :  { %v1509_v45 = vrot.slane %v1313_v52, %v2734_v27  ;;  %v1562_v20 = vrot.slane %v1329_v38, %v2734_v27 }
 0x1f9   :  { %v1319_v56 = vpop.xlane.xlu0 %1318  ;;  %v1315_v57 = vpop.xlane.xlu1 %1314 }
 0x1fa   :  { %v1514_v5 = vrot.slane %v1315_v57, %v2737_v46  ;;  %v1528_v44 = vrot.slane %v1319_v56, %v2744_v50 }
 0x1fc   :  { %v1516_v3 = vsel %vm1515_vm2, %v1514_v5, %v1509_v45 }
 0x1fd   :  { %v1523_v19 = vsel %vm1522_vm3, %v1521_v47, %v1516_v3  ;;  %v1335_v54 = vpop.xlane.xlu0 %1334  ;;  %v1325_v4 = vpop.xlane.xlu1 %1324 }
 0x1fe   :  { %v1530_v21 = vsel %vm1529_vm4, %v1528_v44, %v1523_v19  ;;  %v1576_v25 = vrot.slane %v1335_v54, %v2744_v50  ;;  %v1549_v36 = vrot.slane %v1325_v4, %v2770_v15 }
 0x201   :  { %v1331_v39 = vpop.xlane.xlu0 %1330  ;;  %v1341_v2 = vpop.xlane.xlu1 %1340 }
 0x202   :  { %v1566_v11 = vrot.slane %v1331_v39, %v2737_v46  ;;  %v1591_v51 = vrot.slane %v1341_v2, %v2770_v15 }
 0x204   :  { %v1567_v48 = vsel %vm1515_vm2, %v1566_v11, %v1562_v20 }
 0x205   :  { %v1572_v53 = vsel %vm1522_vm3, %v1571_v24, %v1567_v48  ;;  %v1321_v10 = vpop.xlane.xlu1 %1320  ;;  %v1327_v55 = vpop.xlane.xlu0 %1326 }
 0x206   :  { %v1535_v17 = vrot.slane %v1321_v10, %v2756_v23  ;;  %v1577_v8 = vsel %vm1529_vm4, %v1576_v25, %v1572_v53  ;;  %v1556_v1 = vrot.slane %v1327_v55, %v2773_v49 }
 0x208   :  { %v1537_v28 = vsel %vm1536_vm5, %v1535_v17, %v1530_v21 }
 0x209   :  { %v1337_v34 = vpop.xlane.xlu1 %1336  ;;  %v1343_v13 = vpop.xlane.xlu0 %1342 }
 0x20a   :  { %v1581_v14 = vrot.slane %v1337_v34, %v2756_v23  ;;  %v1596_v58 = vrot.slane %v1343_v13, %v2773_v49 }
 0x20c   :  { %v1582_v0 = vsel %vm1536_vm5, %v1581_v14, %v1577_v8 }
 0x20d   :  { %v1361_v9 = vpop.xlane.xlu1 %1360  ;;  %v1323_v31 = vpop.xlane.xlu0 %1322 }
 0x20e   :  { %v1542_v26 = vrot.slane %v1323_v31, %v2767_v35  ;;  %v1640_v39 = vrot.slane %v1361_v9, %v2734_v27 }
 0x210   :  { %v1544_v18 = vsel %vm1543_vm6, %v1542_v26, %v1537_v28 }
 0x211   :  { %v1551_v6 = vsel %vm1550_vm7, %v1549_v36, %v1544_v18  ;;  %v1339_v37 = vpop.xlane.xlu0 %1338  ;;  %v1351_v7 = vpop.xlane.xlu1 %1350 }
 0x212   :  { %v1558_v32 = vsel %vm1557_vm8, %v1556_v1, %v1551_v6  ;;  %v1586_v33 = vrot.slane %v1339_v37, %v2767_v35  ;;  %v1615_v45 = vrot.slane %v1351_v7, %v2744_v50 }
 0x214   :  { %v1587_v40 = vsel %vm1543_vm6, %v1586_v33, %v1582_v0 }
 0x215   :  { %v1592_v59 = vsel %vm1550_vm7, %v1591_v51, %v1587_v40  ;;  %v1349_v16 = vpop.xlane.xlu0 %1348  ;;  %v1347_v41 = vpop.xlane.xlu1 %1346 }
 0x216   :  { %v1597_v22 = vsel %vm1557_vm8, %v1596_v58, %v1592_v59  ;;  %v1605_v61 = vrot.slane %v1347_v41, %v2737_v46  ;;  %v1610_v57 = vrot.slane %v1349_v16, %v2741_v62 }
 0x217   :  { %v1833_v43 = vsel %vm1832_vm9, %v1597_v22, %v1558_v32 }
 0x219   :  { %v1365_v42 = vpop.xlane.xlu0 %1364  ;;  %v1357_v38 = vpop.xlane.xlu1 %1356 }
 0x21a   :  { %v1649_v20 = vrot.slane %v1365_v42, %v2741_v62  ;;  %v1630_v28 = vrot.slane %v1357_v38, %v2770_v15 }
 0x21d   :  { %v1345_v52 = vpop.xlane.xlu0 %1344  ;;  %v1373_v60 = vpop.xlane.xlu1 %1372 }
 0x21e   :  { %v1601_v56 = vrot.slane %v1345_v52, %v2734_v27  ;;  %v1669_v36 = vrot.slane %v1373_v60, %v2770_v15 }
 0x220   :  { %v1606_v5 = vsel %vm1515_vm2, %v1605_v61, %v1601_v56 }
 0x221   :  { %v1611_v47 = vsel %vm1522_vm3, %v1610_v57, %v1606_v5  ;;  %v1367_v44 = vpop.xlane.xlu0 %1366  ;;  %v1353_v3 = vpop.xlane.xlu1 %1352 }
 0x222   :  { %v1616_v19 = vsel %vm1529_vm4, %v1615_v45, %v1611_v47  ;;  %v1620_v54 = vrot.slane %v1353_v3, %v2756_v23  ;;  %v1654_v11 = vrot.slane %v1367_v44, %v2744_v50 }
 0x224   :  { %v1621_v4 = vsel %vm1536_vm5, %v1620_v54, %v1616_v19 }
 0x225   :  { %v1363_v21 = vpop.xlane.xlu0 %1362  ;;  %v1369_v63 = vpop.xlane.xlu1 %1368 }
 0x226   :  { %v1644_v2 = vrot.slane %v1363_v21, %v2737_v46  ;;  %v1659_v13 = vrot.slane %v1369_v63, %v2756_v23 }
 0x228   :  { %v1645_v24 = vsel %vm1515_vm2, %v1644_v2, %v1640_v39 }
 0x229   :  { %v1650_v25 = vsel %vm1522_vm3, %v1649_v20, %v1645_v24  ;;  %v1359_v48 = vpop.xlane.xlu0 %1358  ;;  %v1381_v53 = vpop.xlane.xlu1 %1380 }
 0x22a   :  { %v1655_v10 = vsel %vm1529_vm4, %v1654_v11, %v1650_v25  ;;  %v1635_v29 = vrot.slane %v1359_v48, %v2773_v49  ;;  %v1688_v63 = vrot.slane %v1381_v53, %v2741_v62 }
 0x22b   :  { %v1660_v1 = vsel %vm1536_vm5, %v1659_v13, %v1655_v10 }
 0x22d   :  { %v1375_v55 = vpop.xlane.xlu0 %1374  ;;  %v1397_v17 = vpop.xlane.xlu1 %1396 }
 0x22e   :  { %v1674_v6 = vrot.slane %v1375_v55, %v2773_v49  ;;  %v1727_v48 = vrot.slane %v1397_v17, %v2741_v62 }
 0x231   :  { %v1355_v8 = vpop.xlane.xlu0 %1354  ;;  %v1377_v30 = vpop.xlane.xlu1 %1376 }
 0x232   :  { %v1625_v12 = vrot.slane %v1355_v8, %v2767_v35  ;;  %v1679_v3 = vrot.slane %v1377_v30, %v2734_v27 }
 0x234   :  { %v1626_v34 = vsel %vm1543_vm6, %v1625_v12, %v1621_v4 }
 0x235   :  { %v1631_v14 = vsel %vm1550_vm7, %v1630_v28, %v1626_v34  ;;  %v1371_v0 = vpop.xlane.xlu0 %1370  ;;  %v1395_v9 = vpop.xlane.xlu1 %1394 }
 0x236   :  { %v1636_v31 = vsel %vm1557_vm8, %v1635_v29, %v1631_v14  ;;  %v1664_v26 = vrot.slane %v1371_v0, %v2767_v35  ;;  %v1722_v39 = vrot.slane %v1395_v9, %v2737_v46 }
 0x237   :  { %v1835_v18 = vsel %vm1834_vm10, %v1636_v31, %v1833_v43 }
 0x238   :  { %v1665_v37 = vsel %vm1543_vm6, %v1664_v26, %v1660_v1 }
 0x239   :  { %v1670_v7 = vsel %vm1550_vm7, %v1669_v36, %v1665_v37  ;;  %v1393_v32 = vpop.xlane.xlu0 %1392  ;;  %v2817_v33 = vpop.xlane.xlu1 %1388 }
 0x23a   :  { %v1675_v51 = vsel %vm1557_vm8, %v1674_v6, %v1670_v7  ;;  %v1718_v4 = vrot.slane %v1393_v32, %v2734_v27 }
 0x23b   :  { %v2820_v58 = vsel %vm1836_vm11, %v1675_v51, %v1835_v18  ;;  %v1708_v18 = vrot.slane %v2817_v33, %v2770_v15 }
 0x23c   :  { %v1723_v20 = vsel %vm1515_vm2, %v1722_v39, %v1718_v4 }
 0x23d   :  { %v1383_v40 = vpop.xlane.xlu0 %1382  ;;  %v1385_v59 = vpop.xlane.xlu1 %1384  ;;  %v1728_v12 = vsel %vm1522_vm3, %v1727_v48, %v1723_v20 }
 0x23e   :  { %v1693_v10 = vrot.slane %v1383_v40, %v2744_v50  ;;  %v1698_v17 = vrot.slane %v1385_v59, %v2756_v23 }
 0x241   :  { %v1399_v16 = vpop.xlane.xlu0 %1398  ;;  %v1401_v41 = vpop.xlane.xlu1 %1400 }
 0x242   :  { %v1732_v11 = vrot.slane %v1399_v16, %v2744_v50  ;;  %v1737_v28 = vrot.slane %v1401_v41, %v2756_v23 }
 0x244   :  { %v1733_v14 = vsel %vm1529_vm4, %v1732_v11, %v1728_v12  ;;  %v1311_v11 = vld [vmem:[#allocation2] sm:$0xff] }
 0x245   :  { %v1379_v22 = vpop.xlane.xlu0 %1378  ;;  %v2822_v43 = vpop.xlane.xlu1 %1390  ;;  %v1738_v6 = vsel %vm1536_vm5, %v1737_v28, %v1733_v14 }
 0x246   :  { %v1683_v44 = vrot.slane %v1379_v22, %v2737_v46 }
 0x248   :  { %v1684_v21 = vsel %vm1515_vm2, %v1683_v44, %v1679_v3 }
 0x249   :  { %v2824_v42 = vpop.xlane.xlu0 %1404  ;;  %v2826_v38 = vpop.xlane.xlu1 %1406  ;;  %v1689_v24 = vsel %vm1522_vm3, %v1688_v63, %v1684_v21 }
 0x24a   :  { %v1694_v29 = vsel %vm1529_vm4, %v1693_v10, %v1689_v24 }
 0x24d   :  { %v1387_v52 = vpop.xlane.xlu0 %1386  ;;  %v1413_v60 = vpop.xlane.xlu1 %1412 }
 0x24e   :  { %v1703_v34 = vrot.slane %v1387_v52, %v2767_v35  ;;  %v1766_v31 = vrot.slane %v1413_v60, %v2741_v62 }
 0x251   :  { %v1403_v61 = vpop.xlane.xlu0 %1402  ;;  %v1429_v56 = vpop.xlane.xlu1 %1428 }
 0x252   :  { %v1742_v0 = vrot.slane %v1403_v61, %v2767_v35  ;;  %v1805_v7 = vrot.slane %v1429_v56, %v2741_v62  ;;  %v1713_v61 = vrot.slane %v2822_v43, %v2773_v49 }
 0x254   :  { %v1743_v51 = vsel %vm1543_vm6, %v1742_v0, %v1738_v6 }
 0x255   :  { %v1409_v57 = vpop.xlane.xlu0 %1408  ;;  %v1411_v45 = vpop.xlane.xlu1 %1410 }
 0x256   :  { %v1757_v55 = vrot.slane %v1409_v57, %v2734_v27  ;;  %v1761_v8 = vrot.slane %v1411_v45, %v2737_v46  ;;  %v1752_v57 = vrot.slane %v2826_v38, %v2773_v49 }
 0x258   :  { %v1762_v9 = vsel %vm1515_vm2, %v1761_v8, %v1757_v55 }
 0x259   :  { %v1425_v5 = vpop.xlane.xlu0 %1424  ;;  %v1427_v47 = vpop.xlane.xlu1 %1426  ;;  %v1767_v40 = vsel %vm1522_vm3, %v1766_v31, %v1762_v9 }
 0x25a   :  { %v1796_v53 = vrot.slane %v1425_v5, %v2734_v27  ;;  %v1800_v30 = vrot.slane %v1427_v47, %v2737_v46  ;;  %v1699_v46 = vsel %vm1536_vm5, %v1698_v17, %v1694_v29 }
 0x25b   :  { %v1704_v37 = vsel %vm1543_vm6, %v1703_v34, %v1699_v46 }
 0x25c   :  { %v1801_v26 = vsel %vm1515_vm2, %v1800_v30, %v1796_v53  ;;  %v1709_v62 = vsel %vm1550_vm7, %v1708_v18, %v1704_v37 }
 0x25d   :  { %v1415_v19 = vpop.xlane.xlu0 %1414  ;;  %v1417_v54 = vpop.xlane.xlu1 %1416  ;;  %v1806_v41 = vsel %vm1522_vm3, %v1805_v7, %v1801_v26  ;;  %v1714_v3 = vsel %vm1557_vm8, %v1713_v61, %v1709_v62 }
 0x25e   :  { %v1771_v27 = vrot.slane %v1415_v19, %v2744_v50  ;;  %v1776_v59 = vrot.slane %v1417_v54, %v2756_v23  ;;  %v1839_v63 = vsel %vm1838_vm12, %v1714_v3, %v2820_v58 }
 0x260   :  { %v1772_v33 = vsel %vm1529_vm4, %v1771_v27, %v1767_v40 }
 0x261   :  { %v1431_v2 = vpop.xlane.xlu0 %1430  ;;  %v1419_v25 = vpop.xlane.xlu1 %1418  ;;  %v1777_v45 = vsel %vm1536_vm5, %v1776_v59, %v1772_v33 }
 0x262   :  { %v1810_v36 = vrot.slane %v1431_v2, %v2744_v50  ;;  %v1747_v50 = vrot.slane %v2824_v42, %v2770_v15  ;;  %v1781_v22 = vrot.slane %v1419_v25, %v2767_v35 }
 0x264   :  { %v1811_v52 = vsel %vm1529_vm4, %v1810_v36, %v1806_v41  ;;  %v1782_v19 = vsel %vm1543_vm6, %v1781_v22, %v1777_v45 }
 0x265   :  { %v1421_v13 = vpop.xlane.xlu0 %1420  ;;  %v1435_v1 = vpop.xlane.xlu1 %1434 }
 0x266   :  { %v1786_v60 = vrot.slane %v1421_v13, %v2770_v15  ;;  %v1820_v5 = vrot.slane %v1435_v1, %v2767_v35 }
 0x268   :  { %v1787_v54 = vsel %vm1550_vm7, %v1786_v60, %v1782_v19 }
 0x269   :  { %v1433_v32 = vpop.xlane.xlu0 %1432  ;;  %v1437_v47 = vpop.xlane.xlu1 %1436 }
 0x26a   :  { %v1815_v16 = vrot.slane %v1433_v32, %v2756_v23  ;;  %v1748_v23 = vsel %vm1550_vm7, %v1747_v50, %v1743_v51  ;;  %v1825_v38 = vrot.slane %v1437_v47, %v2770_v15  ;;  %v1949_v15 = vld [vmem:[%s2905_s4] ss:$0 sm:$0xff] }
 0x26b   :  { %v1753_v43 = vsel %vm1557_vm8, %v1752_v57, %v1748_v23 }
 0x26c   :  { %v1816_v56 = vsel %vm1536_vm5, %v1815_v16, %v1811_v52  ;;  %v1841_v20 = vsel %vm1840_vm13, %v1753_v43, %v1839_v63 }
 0x26d   :  { %v1423_v42 = vpop.xlane.xlu0 %1422  ;;  %v1821_v4 = vsel %vm1543_vm6, %v1820_v5, %v1816_v56 }
 0x26e   :  { %v1791_v44 = vrot.slane %v1423_v42, %v2773_v49  ;;  %v1826_v2 = vsel %vm1550_vm7, %v1825_v38, %v1821_v4 }
 0x270   :  { %v1792_v35 = vsel %vm1557_vm8, %v1791_v44, %v1787_v54 }
 0x271   :  { %v1439_v21 = vpop.xlane.xlu0 %1438  ;;  %v1843_v24 = vsel %vm1842_vm14, %v1792_v35, %v1841_v20 }
 0x272   :  { %v1830_v39 = vrot.slane %v1439_v21, %v2773_v49 }
 0x274   :  { %v1831_v25 = vsel %vm1557_vm8, %v1830_v39, %v1826_v2 }
 0x275   :  { %v1845_v48 = vsel %vm1844_vm15, %v1831_v25, %v1843_v24 }
 0x276   :  { %v1847_v10 = vmax.f32 %v1311_v11, %v1845_v48 }
 0x278   :  { %1849 = vst.msk [vmem:[#allocation2] sm:$0xff] %vm26_vm1, %v1847_v10 }
 0x27f   :  { %v1853_v58 = vld [vmem:[#allocation2] sm:$0xff] }
 0x280   :  { %v1861_v55 = vadd.f32 %v1949_v15, %v1853_v58 }
 0x282   :  { %1862 = vst.msk [vmem:[#allocation2] sm:$0xff] %vm26_vm1, %v1861_v55 }
 0x283   :  { %2142 = shalt.err (!%p2139_p4)
}
 0x284   :  { %1872 = dma.vmem_to_hbm [thread:$0]  %s1870_s23, 128, %s2906_s5, [#allocation3]  }
 0x285   :  { %2151 = dma.done.wait [#allocation3], 128  }
 0x286   :  { %2152 = vsyncadd [#allocation3], 4294967168 }
 0x287   :  { %1876 = vsyncpa [#allocation3], 1 }

</bundles_post_ra>
